<compile_context>
chip_gen: v6e
topology: v6e:2x2x1
jax: 0.10.0
libtpu: 0.0.40
codegen_flags: <defaults>
</compile_context>

<pallas_src>
import functools

import jax
import jax.numpy as jnp
from jax.experimental import pallas as pl
from jax.experimental.pallas import tpu as pltpu


def _actor_kernel(x_ref, w1_ref, b1_ref, w2_ref, b2_ref, w3_ref, b3_ref,
                  out_ref, *, a_limit):
    x = x_ref[...]                                                      # (TM, s_dim)
    h1 = jnp.dot(x, w1_ref[...], preferred_element_type=jnp.float32)    # (TM, 32)
    h1 = jnp.maximum(h1 + b1_ref[...], 0.0)                             # ReLU (VPU)
    h2 = jnp.dot(h1, w2_ref[...], preferred_element_type=jnp.float32)   # (TM, 32)
    h2 = jnp.maximum(h2 + b2_ref[...], 0.0)                             # ReLU (VPU)
    a = jnp.dot(h2, w3_ref[...], preferred_element_type=jnp.float32)    # (TM, a_dim)
    out_ref[...] = a_limit * jnp.tanh(a + b3_ref[...])                  # tanh on EUP


def _round_up(n, m):
    return ((n + m - 1) // m) * m


def actor_forward(x, params, a_limit, *, block_b=128):
    """x: (B, s_dim) f32 -> (B, a_dim) f32 == a_limit * tanh(MLP(x))."""
    w1, b1, w2, b2, w3, b3 = params
    B, s_dim = x.shape
    a_dim = w3.shape[1]

    # Batch tile: multiple of 8 sublanes; pad B so the grid divides evenly.
    tm = min(block_b, _round_up(B, 8))
    bp = _round_up(B, tm)
    if bp != B:
        x = jnp.pad(x, ((0, bp - B), (0, 0)))

    # Whole-array, VMEM-resident specs for the tiny weights/biases.
    resident = pl.BlockSpec(memory_space=pltpu.MemorySpace.VMEM)

    out = pl.pallas_call(
        functools.partial(_actor_kernel, a_limit=float(a_limit)),
        out_shape=jax.ShapeDtypeStruct((bp, a_dim), jnp.float32),
        grid=(bp // tm,),
        in_specs=[pl.BlockSpec((tm, s_dim), lambda i: (i, 0)),   # batch-tiled input
                  resident, resident, resident, resident, resident, resident],
        out_specs=pl.BlockSpec((tm, a_dim), lambda i: (i, 0)),
        compiler_params=pltpu.CompilerParams(
            dimension_semantics=("parallel",)),                  # megacore split on v7x
    )(x, w1, b1, w2, b2, w3, b3)

    return out[:B] if bp != B else out


def init_actor_params(key, s_dim, a_dim, hidden=32):
    """Mirrors nn.Linear's U(-1/sqrt(fan_in), 1/sqrt(fan_in)) init.
    Weights stored as (in, out); biases as (1, out) for lane-wise broadcast."""
    def linear(key, fan_in, fan_out):
        kw, kb = jax.random.split(key)
        bound = 1.0 / jnp.sqrt(jnp.float32(fan_in))
        w = jax.random.uniform(kw, (fan_in, fan_out), jnp.float32, -bound, bound)
        b = jax.random.uniform(kb, (1, fan_out), jnp.float32, -bound, bound)
        return w, b

    k1, k2, k3 = jax.random.split(key, 3)
    w1, b1 = linear(k1, s_dim, hidden)
    w2, b2 = linear(k2, hidden, hidden)
    w3, b3 = linear(k3, hidden, a_dim)
    return (w1, b1, w2, b2, w3, b3)


if __name__ == "__main__":
    key = jax.random.PRNGKey(0)
    k_params, k_x1, k_x2 = jax.random.split(key, 3)

    s_dim, a_dim, a_limit = 12, 4, 2.0
    params = init_actor_params(k_params, s_dim, a_dim)
    w1, b1, w2, b2, w3, b3 = params

    def ref_fwd(x):
        h1 = jnp.maximum(x @ w1 + b1, 0.0)
        h2 = jnp.maximum(h1 @ w2 + b2, 0.0)
        return a_limit * jnp.tanh(h2 @ w3 + b3)

    # Case 1: replay-batch sized call (grid of 2 tiles, "parallel" batch axis).
    x_big = jax.random.normal(k_x1, (256, s_dim), jnp.float32)
    out_big = actor_forward(x_big, params, a_limit)
    jax.block_until_ready(out_big)
    assert out_big.shape == (256, a_dim)
    assert jnp.allclose(out_big, ref_fwd(x_big), atol=2e-5, rtol=2e-5)

    # Case 2: ragged small batch (exercises sublane padding + slice-off).
    x_small = jax.random.normal(k_x2, (5, s_dim), jnp.float32)
    out_small = actor_forward(x_small, params, a_limit)
    jax.block_until_ready(out_small)
    assert out_small.shape == (5, a_dim)
    assert jnp.allclose(out_small, ref_fwd(x_small), atol=2e-5, rtol=2e-5)

    print("KERNEL_OK")
</pallas_src>

<mosaic_0001>
module attributes {stable_mosaic.version = 11 : i64} {
  func.func @_actor_kernel(%arg0: i32, %arg1: memref<128x12xf32, #tpu.memory_space<vmem>>, %arg2: memref<12x32xf32, #tpu.memory_space<vmem>>, %arg3: memref<1x32xf32, #tpu.memory_space<vmem>>, %arg4: memref<32x32xf32, #tpu.memory_space<vmem>>, %arg5: memref<1x32xf32, #tpu.memory_space<vmem>>, %arg6: memref<32x4xf32, #tpu.memory_space<vmem>>, %arg7: memref<1x4xf32, #tpu.memory_space<vmem>>, %arg8: memref<128x4xf32, #tpu.memory_space<vmem>>) attributes {dimension_semantics = [#tpu.dimension_semantics<parallel>], iteration_bounds = array<i64: 2>, scalar_prefetch = 0 : i64, scratch_operands = 0 : i64, tpu.core_type = #tpu.core_type<tc>, window_params = [{transform_indices = @transform_0, window_bounds = array<i64: 128, 12>}, {pipeline_mode = #tpu.pipeline_mode<synchronous>, transform_indices = @transform_1, window_bounds = array<i64: 12, 32>}, {pipeline_mode = #tpu.pipeline_mode<synchronous>, transform_indices = @transform_2, window_bounds = array<i64: 1, 32>}, {pipeline_mode = #tpu.pipeline_mode<synchronous>, transform_indices = @transform_3, window_bounds = array<i64: 32, 32>}, {pipeline_mode = #tpu.pipeline_mode<synchronous>, transform_indices = @transform_4, window_bounds = array<i64: 1, 32>}, {pipeline_mode = #tpu.pipeline_mode<synchronous>, transform_indices = @transform_5, window_bounds = array<i64: 32, 4>}, {pipeline_mode = #tpu.pipeline_mode<synchronous>, transform_indices = @transform_6, window_bounds = array<i64: 1, 4>}, {transform_indices = @transform_7, window_bounds = array<i64: 128, 4>}]} {
    %c0 = arith.constant 0 : index
    %c0_0 = arith.constant 0 : index
    %0 = vector.load %arg1[%c0, %c0_0] : memref<128x12xf32, #tpu.memory_space<vmem>>, vector<128x12xf32>
    %c0_1 = arith.constant 0 : index
    %c0_2 = arith.constant 0 : index
    %1 = vector.load %arg2[%c0_1, %c0_2] : memref<12x32xf32, #tpu.memory_space<vmem>>, vector<12x32xf32>
    %cst = arith.constant dense<0.000000e+00> : vector<128x32xf32>
    %2 = tpu.matmul %0, %1, %cst {dimension_numbers = #tpu.dot_dimension_numbers<[1], [0], [0], [1], [0, 0, 1, 1], [], []>} : vector<128x12xf32>, vector<12x32xf32>, vector<128x32xf32> -> vector<128x32xf32>
    %c0_3 = arith.constant 0 : index
    %c0_4 = arith.constant 0 : index
    %3 = vector.load %arg3[%c0_3, %c0_4] : memref<1x32xf32, #tpu.memory_space<vmem>>, vector<1x32xf32>
    %4 = vector.broadcast %3 : vector<1x32xf32> to vector<128x32xf32>
    %5 = arith.addf %2, %4 : vector<128x32xf32>
    %cst_5 = arith.constant 0.000000e+00 : f32
    %6 = vector.broadcast %cst_5 : f32 to vector<128x32xf32>
    %7 = arith.maximumf %5, %6 : vector<128x32xf32>
    %c0_6 = arith.constant 0 : index
    %c0_7 = arith.constant 0 : index
    %8 = vector.load %arg4[%c0_6, %c0_7] : memref<32x32xf32, #tpu.memory_space<vmem>>, vector<32x32xf32>
    %cst_8 = arith.constant dense<0.000000e+00> : vector<128x32xf32>
    %9 = tpu.matmul %7, %8, %cst_8 {dimension_numbers = #tpu.dot_dimension_numbers<[1], [0], [0], [1], [0, 0, 1, 1], [], []>} : vector<128x32xf32>, vector<32x32xf32>, vector<128x32xf32> -> vector<128x32xf32>
    %c0_9 = arith.constant 0 : index
    %c0_10 = arith.constant 0 : index
    %10 = vector.load %arg5[%c0_9, %c0_10] : memref<1x32xf32, #tpu.memory_space<vmem>>, vector<1x32xf32>
    %11 = vector.broadcast %10 : vector<1x32xf32> to vector<128x32xf32>
    %12 = arith.addf %9, %11 : vector<128x32xf32>
    %cst_11 = arith.constant 0.000000e+00 : f32
    %13 = vector.broadcast %cst_11 : f32 to vector<128x32xf32>
    %14 = arith.maximumf %12, %13 : vector<128x32xf32>
    %c0_12 = arith.constant 0 : index
    %c0_13 = arith.constant 0 : index
    %15 = vector.load %arg6[%c0_12, %c0_13] : memref<32x4xf32, #tpu.memory_space<vmem>>, vector<32x4xf32>
    %cst_14 = arith.constant dense<0.000000e+00> : vector<128x4xf32>
    %16 = tpu.matmul %14, %15, %cst_14 {dimension_numbers = #tpu.dot_dimension_numbers<[1], [0], [0], [1], [0, 0, 1, 1], [], []>} : vector<128x32xf32>, vector<32x4xf32>, vector<128x4xf32> -> vector<128x4xf32>
    %c0_15 = arith.constant 0 : index
    %c0_16 = arith.constant 0 : index
    %17 = vector.load %arg7[%c0_15, %c0_16] : memref<1x4xf32, #tpu.memory_space<vmem>>, vector<1x4xf32>
    %18 = vector.broadcast %17 : vector<1x4xf32> to vector<128x4xf32>
    %19 = arith.addf %16, %18 : vector<128x4xf32>
    %20 = math.tanh %19 : vector<128x4xf32>
    %cst_17 = arith.constant 2.000000e+00 : f32
    %21 = vector.broadcast %cst_17 : f32 to vector<128x4xf32>
    %22 = arith.mulf %21, %20 : vector<128x4xf32>
    %c0_18 = arith.constant 0 : index
    %c0_19 = arith.constant 0 : index
    %23 = vector.load %arg8[%c0_18, %c0_19] : memref<128x4xf32, #tpu.memory_space<vmem>>, vector<128x4xf32>
    tpu.vector_store %arg8[%c0_18, %c0_19], %22 {strides = array<i32>} : memref<128x4xf32, #tpu.memory_space<vmem>>, vector<128x4xf32>,
    return
  }
  func.func @transform_0(%arg0: i32) -> (i32, i32) {
    %c0_i32 = arith.constant 0 : i32
    %c0_i32_0 = arith.constant 0 : i32
    return %arg0, %c0_i32 : i32, i32
  }
  func.func @transform_1(%arg0: i32) -> (i32, i32) {
    %c0_i32 = arith.constant 0 : i32
    %c0_i32_0 = arith.constant 0 : i32
    %c0_i32_1 = arith.constant 0 : i32
    return %c0_i32, %c0_i32_0 : i32, i32
  }
  func.func @transform_2(%arg0: i32) -> (i32, i32) {
    %c0_i32 = arith.constant 0 : i32
    %c0_i32_0 = arith.constant 0 : i32
    %c0_i32_1 = arith.constant 0 : i32
    return %c0_i32, %c0_i32_0 : i32, i32
  }
  func.func @transform_3(%arg0: i32) -> (i32, i32) {
    %c0_i32 = arith.constant 0 : i32
    %c0_i32_0 = arith.constant 0 : i32
    %c0_i32_1 = arith.constant 0 : i32
    return %c0_i32, %c0_i32_0 : i32, i32
  }
  func.func @transform_4(%arg0: i32) -> (i32, i32) {
    %c0_i32 = arith.constant 0 : i32
    %c0_i32_0 = arith.constant 0 : i32
    %c0_i32_1 = arith.constant 0 : i32
    return %c0_i32, %c0_i32_0 : i32, i32
  }
  func.func @transform_5(%arg0: i32) -> (i32, i32) {
    %c0_i32 = arith.constant 0 : i32
    %c0_i32_0 = arith.constant 0 : i32
    %c0_i32_1 = arith.constant 0 : i32
    return %c0_i32, %c0_i32_0 : i32, i32
  }
  func.func @transform_6(%arg0: i32) -> (i32, i32) {
    %c0_i32 = arith.constant 0 : i32
    %c0_i32_0 = arith.constant 0 : i32
    %c0_i32_1 = arith.constant 0 : i32
    return %c0_i32, %c0_i32_0 : i32, i32
  }
  func.func @transform_7(%arg0: i32) -> (i32, i32) {
    %c0_i32 = arith.constant 0 : i32
    %c0_i32_0 = arith.constant 0 : i32
    return %arg0, %c0_i32 : i32, i32
  }
}

</mosaic_0001>

<bundles_post_ra>
// kernel: tpu_custom_call.1
= control target key start
LH: loop header
LB: loop body
LE: loop exit
PB: predicated region body
PF: predicated region fallthrough
CT: control target
= control target key end

     0   :  { %s1356_s24 = smov 0   ;;  %s1537_s0 = inlined_call_operand.vmem [shape: f32[256,12], index: 0, kind: input, shape index: {}]   ;;  %s1538_s1 = inlined_call_operand.vmem [shape: f32[12,32], index: 1, kind: input, shape index: {}]   ;;  %s1539_s2 = inlined_call_operand.vmem [shape: f32[1,32], index: 2, kind: input, shape index: {}]   ;;  %s1540_s3 = inlined_call_operand.vmem [shape: f32[32,32], index: 3, kind: input, shape index: {}]   ;;  %s1541_s4 = inlined_call_operand.vmem [shape: f32[1,32], index: 4, kind: input, shape index: {}]   ;;  %s1542_s5 = inlined_call_operand.vmem [shape: f32[32,4], index: 5, kind: input, shape index: {}]   ;;  %s1543_s6 = inlined_call_operand.vmem [shape: f32[1,4], index: 6, kind: input, shape index: {}]   ;;  %s1544_s7 = inlined_call_operand.vmem [shape: f32[256,4], index: 7, kind: output, shape index: {}]  }
   0x1 LB: > { %s1051_s25 = sadd.s32 4294967295, %s1314_s24   ;;  %p1055_p0 = scmp.ge.s32.totalorder %s1314_s24, 1  ;;  %s1314_s24 = sphi %s1356_s24, %s17_s24  }
   0x2   : > { %p238_p1 = scmp.lt.s32.totalorder %s1314_s24, 3 }
   0x4   : > { %p239_p2 = pnand %p1055_p0, %p238_p1 }
   0x5   : > { %s1056_s30 = sshll.u32 (!%p239_p2), %s1051_s25, 4 }
   0x6   : > { %242 = sbr.rel (%p239_p2) target bundleno = 659 (0x293), region = 48  ;;  %p271_p3 = scmp.lt.s32.totalorder (!%p239_p2), %s1056_s30, 31 }
   0xb   : > { %v299_v0 = vld [vmem:[%s1538_s1 + $0x8] sm:$0xf]  ;;  %vm356_vm0 = vcmask 1043456   ;;  %v298_v1 = vld [vmem:[%s1538_s1] sm:$0xff]  ;;  %v524_v2 = vld [vmem:[%s1540_s3 + $0x18] sm:$0xff]  ;;  %s1546_s30 = smov (!%p271_p3, %s1056_s30), 31 }
   0xc   : > { %1172 = vmatprep.subr.msk.mxu0 %vm356_vm0, %v299_v0  ;;  %1264 = vmatprep.subr.msk.mxu1 %vm356_vm0, %v299_v0  ;;  %s1057_s10 = sshll.u32 %s1546_s30, 3  ;;  %vm307_vm1 = vcmask 97280   ;;  %v523_v7 = vld [vmem:[%s1540_s3 + $0x10] sm:$0xff]  ;;  %v522_v13 = vld [vmem:[%s1540_s3 + $0x8] sm:$0xff]  ;;  %v521_v21 = vld [vmem:[%s1540_s3] sm:$0xff]  ;;  %vm532_vm2 = vcmask 261120  }
   0xd   : > { %1173 = vmatpush3.msk.msra.mxu0 %vm356_vm0, %v299_v0  ;;  %1266 = vmatpush3.msk.msra.mxu1 %vm356_vm0, %v299_v0  ;;  %s1381_s13 = scalar_lea.vmem %s1537_s0, %s1057_s10  ;;  %v745_v22 = vld [vmem:[%s1542_s5 + $0x18] sm:$0xff]  ;;  %v744_v23 = vld [vmem:[%s1542_s5 + $0x10] sm:$0xff]  ;;  %v743_v24 = vld [vmem:[%s1542_s5 + $0x8] sm:$0xff]  ;;  %s1492_s16 = scalar_lea.vmem %s1544_s7, %s1057_s10  ;;  %vm978_vm3 = vcmask 31744  }
   0xe   : > { %1174 = vmatprep.subr.mxu0 %v298_v1  ;;  %1265 = vmatprep.subr.mxu1 %v298_v1  ;;  %v282_v3 = vld [vmem:[%s1381_s13] sm:$0xff]  ;;  %v283_v4 = vld [vmem:[%s1381_s13 + $0x8] sm:$0xff]  ;;  %v284_v5 = vld [vmem:[%s1381_s13 + $0x10] sm:$0xff] }
   0xf   : > { %1175 = vmatpush3.msra.mxu0 %v298_v1  ;;  %1267 = vmatpush3.msra.mxu1 %v298_v1  ;;  %v290_v6 = vld [vmem:[%s1381_s13 + $0x40] sm:$0xff]  ;;  %v285_v8 = vld [vmem:[%s1381_s13 + $0x18] sm:$0xff]  ;;  %v291_v9 = vld [vmem:[%s1381_s13 + $0x48] sm:$0xff] }
  0x10   : > { %1200 = vmatprep.subr.mxu1 %v524_v2  ;;  %1176 = vmatprep.mubr.msk.f32.mxu0 %vm307_vm1, %v282_v3  ;;  %v292_v10 = vld [vmem:[%s1381_s13 + $0x50] sm:$0xff]  ;;  %v286_v11 = vld [vmem:[%s1381_s13 + $0x20] sm:$0xff]  ;;  %v293_v12 = vld [vmem:[%s1381_s13 + $0x58] sm:$0xff] }
  0x11   : > { %1177 = vmatmul.mubr.msk.f32.vlgmr.msra.gmra.mxu0 %vm307_vm1, %v283_v4  ;;  %1188 = vmatprep.mubr.msk.f32.mxu1 %vm307_vm1, %v290_v6  ;;  %v294_v14 = vld [vmem:[%s1381_s13 + $0x60] sm:$0xff]  ;;  %v287_v15 = vld [vmem:[%s1381_s13 + $0x28] sm:$0xff]  ;;  %v288_v16 = vld [vmem:[%s1381_s13 + $0x30] sm:$0xff] }
  0x12   : > { %1179 = vmatprep.mubr.msk.f32.mxu0 %vm307_vm1, %v284_v5  ;;  %1189 = vmatmul.mubr.msk.f32.vlgmr.msra.gmra.mxu1 %vm307_vm1, %v291_v9  ;;  %v295_v17 = vld [vmem:[%s1381_s13 + $0x68] sm:$0xff]  ;;  %v296_v18 = vld [vmem:[%s1381_s13 + $0x70] sm:$0xff]  ;;  %v289_v19 = vld [vmem:[%s1381_s13 + $0x38] sm:$0xff] }
  0x13   : > { %1191 = vmatprep.mubr.msk.f32.mxu1 %vm307_vm1, %v292_v10  ;;  %1201 = vmatpush3.msra.mxu1 %v524_v2  ;;  %v297_v20 = vld [vmem:[%s1381_s13 + $0x78] sm:$0xff]  ;;  %v1060_v25 = vld [vmem:[%s1539_s2] ss:$0 sm:$0xff] }
  0x14   : > { %1202 = vmatprep.subr.mxu1 %v523_v7  ;;  %1232 = vmatprep.subr.mxu0 %v745_v22  ;;  %v742_v10 = vld [vmem:[%s1542_s5] sm:$0xff] }
  0x15   : > { %1180 = vmatmul.mubr.msk.f32.gmra.mxu0 %vm307_vm1, %v285_v8  ;;  %1203 = vmatpush3.msra.mxu1 %v523_v7 }
  0x16   : > { %1182 = vmatprep.mubr.msk.f32.mxu0 %vm307_vm1, %v286_v11  ;;  %1192 = vmatmul.mubr.msk.f32.gmra.mxu1 %vm307_vm1, %v293_v12  ;;  %v1078_v11 = vld [vmem:[%s1541_s4] ss:$0 sm:$0xff] }
  0x17   : > { %1204 = vmatprep.subr.mxu1 %v522_v13  ;;  %1194 = vmatprep.mubr.msk.f32.mxu1 %vm307_vm1, %v294_v14 }
  0x18   : > { %1205 = vmatpush3.msra.mxu1 %v522_v13  ;;  %1233 = vmatpush3.msra.mxu0 %v745_v22 }
  0x19   : > { %1183 = vmatmul.mubr.msk.f32.gmra.mxu0 %vm307_vm1, %v287_v15  ;;  %1206 = vmatprep.subr.mxu1 %v521_v21 }
  0x1a   : > { %1185 = vmatprep.mubr.msk.f32.mxu0 %vm307_vm1, %v288_v16  ;;  %1195 = vmatmul.mubr.msk.f32.gmra.mxu1 %vm307_vm1, %v295_v17 }
  0x1b   : > { %1197 = vmatprep.mubr.msk.f32.mxu1 %vm307_vm1, %v296_v18  ;;  %1207 = vmatpush3.msra.mxu1 %v521_v21 }
  0x1c   : > { %1234 = vmatprep.subr.mxu0 %v744_v23 }
  0x1d   : > { %1186 = vmatmul.mubr.msk.f32.gmra.mxu0 %vm307_vm1, %v289_v19 }
  0x1e   : > { %1198 = vmatmul.mubr.msk.f32.gmra.mxu1 %vm307_vm1, %v297_v20  ;;  %1235 = vmatpush3.msra.mxu0 %v744_v23 }
  0x1f   : > { %1236 = vmatprep.subr.mxu0 %v743_v24 }
  0x20   : > { %1237 = vmatpush3.msra.mxu0 %v743_v24 }
  0x21   : > { %1238 = vmatprep.subr.mxu0 %v742_v10 }
  0x22   : > { %1239 = vmatpush3.msra.mxu0 %v742_v10 }
  0xd1   : > { %v1178_v26 = vpop.f32.mrf.mxu0 }
  0xd2   : > { %v432_v27 = vadd.f32 %v1178_v26, %v1060_v25  ;;  %v1190_v29 = vpop.f32.mrf.mxu1 }
  0xd3   : > { %v426_v28 = vpop.f32.mrf.mxu0  ;;  %v472_v59 = vadd.f32 %v1190_v29, %v1060_v25 }
  0xd4   : > { %v427_v30 = vadd.f32 %v1060_v25, %v426_v28  ;;  %v466_v32 = vpop.f32.mrf.mxu1  ;;  %v506_v34 = vmax.f32 %v432_v27, 0.0 }
  0xd5   : > { %v1181_v31 = vpop.f32.mrf.mxu0  ;;  %v467_v49 = vadd.f32 %v1060_v25, %v466_v32  ;;  %v514_v63 = vmax.f32 %v472_v59, 0.0 }
  0xd6   : > { %v505_v33 = vmax.f32 %v427_v30, 0.0  ;;  %v442_v35 = vadd.f32 %v1181_v31, %v1060_v25  ;;  %v1193_v37 = vpop.f32.mrf.mxu1 }
  0xd7   : > { %v436_v36 = vpop.f32.mrf.mxu0  ;;  %v513_v56 = vmax.f32 %v467_v49, 0.0  ;;  %v482_v0 = vadd.f32 %v1193_v37, %v1060_v25 }
  0xd8   : > { %v437_v38 = vadd.f32 %v1060_v25, %v436_v36  ;;  %1208 = vmatprep.mubr.msk.f32.mxu1 %vm532_vm2, %v505_v33  ;;  %v476_v40 = vpop.f32.mrf.mxu1  ;;  %v508_v42 = vmax.f32 %v442_v35, 0.0 }
  0xd9   : > { %v1184_v39 = vpop.f32.mrf.mxu0  ;;  %1209 = vmatmul.mubr.msk.f32.vlgmr.msra.gmra.mxu1 %vm532_vm2, %v506_v34  ;;  %v477_v57 = vadd.f32 %v1060_v25, %v476_v40  ;;  %v516_v4 = vmax.f32 %v482_v0, 0.0 }
  0xda   : > { %v507_v41 = vmax.f32 %v437_v38, 0.0  ;;  %v452_v43 = vadd.f32 %v1184_v39, %v1060_v25  ;;  %v1196_v45 = vpop.f32.mrf.mxu1 }
  0xdb   : > { %v446_v44 = vpop.f32.mrf.mxu0  ;;  %v515_v61 = vmax.f32 %v477_v57, 0.0  ;;  %v492_v5 = vadd.f32 %v1196_v45, %v1060_v25 }
  0xdc   : > { %v447_v46 = vadd.f32 %v1060_v25, %v446_v44  ;;  %1211 = vmatprep.mubr.msk.f32.mxu1 %vm532_vm2, %v507_v41  ;;  %v510_v50 = vmax.f32 %v452_v43, 0.0  ;;  %v486_v53 = vpop.f32.mrf.mxu1 }
  0xdd   : > { %v1187_v47 = vpop.f32.mrf.mxu0  ;;  %1212 = vmatmul.mubr.msk.f32.gmra.mxu1 %vm532_vm2, %v508_v42  ;;  %v487_v62 = vadd.f32 %v1060_v25, %v486_v53  ;;  %v518_v7 = vmax.f32 %v492_v5, 0.0 }
  0xde   : > { %v509_v48 = vmax.f32 %v447_v46, 0.0  ;;  %v462_v51 = vadd.f32 %v1187_v47, %v1060_v25  ;;  %v1199_v60 = vpop.f32.mrf.mxu1 }
  0xdf   : > { %v456_v52 = vpop.f32.mrf.mxu0  ;;  %v517_v2 = vmax.f32 %v487_v62, 0.0  ;;  %v502_v8 = vadd.f32 %v1199_v60, %v1060_v25  ;;  %v1477_v60 = vld [vmem:[%s1543_s6] ss:$0 sm:$0xff] }
  0xe0   : > { %v457_v54 = vadd.f32 %v1060_v25, %v456_v52  ;;  %1214 = vmatprep.mubr.msk.f32.mxu1 %vm532_vm2, %v509_v48  ;;  %v512_v58 = vmax.f32 %v462_v51, 0.0  ;;  %v496_v1 = vpop.f32.mrf.mxu1 }
  0xe1   : > { %1215 = vmatmul.mubr.msk.f32.gmra.mxu1 %vm532_vm2, %v510_v50  ;;  %v497_v3 = vadd.f32 %v1060_v25, %v496_v1  ;;  %v520_v9 = vmax.f32 %v502_v8, 0.0 }
  0xe2   : > { %v511_v55 = vmax.f32 %v457_v54, 0.0 }
  0xe3   : > { %v519_v6 = vmax.f32 %v497_v3, 0.0 }
  0xe4   : > { %1217 = vmatprep.mubr.msk.f32.mxu1 %vm532_vm2, %v511_v55 }
  0xe5   : > { %1218 = vmatmul.mubr.msk.f32.gmra.mxu1 %vm532_vm2, %v512_v58 }
  0xe6   : > { %1220 = vmatprep.mubr.msk.f32.mxu1 %vm532_vm2, %v513_v56 }
  0xe9   : > { %1221 = vmatmul.mubr.msk.f32.gmra.mxu1 %vm532_vm2, %v514_v63 }
  0xea   : > { %1223 = vmatprep.mubr.msk.f32.mxu1 %vm532_vm2, %v515_v61 }
  0xed   : > { %1224 = vmatmul.mubr.msk.f32.gmra.mxu1 %vm532_vm2, %v516_v4 }
  0xee   : > { %1226 = vmatprep.mubr.msk.f32.mxu1 %vm532_vm2, %v517_v2 }
  0xf1   : > { %1227 = vmatmul.mubr.msk.f32.gmra.mxu1 %vm532_vm2, %v518_v7 }
  0xf2   : > { %1229 = vmatprep.mubr.msk.f32.mxu1 %vm532_vm2, %v519_v6 }
  0xf5   : > { %1230 = vmatmul.mubr.msk.f32.gmra.mxu1 %vm532_vm2, %v520_v9 }
 0x199   : > { %v1210_v12 = vpop.f32.mrf.mxu1 }
 0x19a   : > { %v653_v13 = vadd.f32 %v1210_v12, %v1078_v11 }
 0x19b   : > { %v647_v14 = vpop.f32.mrf.mxu1 }
 0x19c   : > { %v648_v15 = vadd.f32 %v1078_v11, %v647_v14  ;;  %v727_v18 = vmax.f32 %v653_v13, 0.0 }
 0x19d   : > { %v1213_v16 = vpop.f32.mrf.mxu1 }
 0x19e   : > { %v726_v17 = vmax.f32 %v648_v15, 0.0  ;;  %v663_v19 = vadd.f32 %v1213_v16, %v1078_v11 }
 0x19f   : > { %v657_v20 = vpop.f32.mrf.mxu1 }
 0x1a0   : > { %v658_v21 = vadd.f32 %v1078_v11, %v657_v20  ;;  %1240 = vmatprep.mubr.msk.f32.mxu0 %vm532_vm2, %v726_v17  ;;  %v729_v24 = vmax.f32 %v663_v19, 0.0 }
 0x1a1   : > { %v1216_v22 = vpop.f32.mrf.mxu1  ;;  %1241 = vmatmul.mubr.msk.f32.vlgmr.msra.gmra.mxu0 %vm532_vm2, %v727_v18 }
 0x1a2   : > { %v728_v23 = vmax.f32 %v658_v21, 0.0  ;;  %v673_v25 = vadd.f32 %v1216_v22, %v1078_v11 }
 0x1a3   : > { %v667_v26 = vpop.f32.mrf.mxu1 }
 0x1a4   : > { %v668_v27 = vadd.f32 %v1078_v11, %v667_v26  ;;  %1243 = vmatprep.mubr.msk.f32.mxu0 %vm532_vm2, %v728_v23  ;;  %v731_v30 = vmax.f32 %v673_v25, 0.0 }
 0x1a5   : > { %v1219_v28 = vpop.f32.mrf.mxu1  ;;  %1244 = vmatmul.mubr.msk.f32.gmra.mxu0 %vm532_vm2, %v729_v24 }
 0x1a6   : > { %v730_v29 = vmax.f32 %v668_v27, 0.0  ;;  %v683_v31 = vadd.f32 %v1219_v28, %v1078_v11 }
 0x1a7   : > { %v677_v32 = vpop.f32.mrf.mxu1 }
 0x1a8   : > { %v678_v33 = vadd.f32 %v1078_v11, %v677_v32  ;;  %1246 = vmatprep.mubr.msk.f32.mxu0 %vm532_vm2, %v730_v29  ;;  %v733_v36 = vmax.f32 %v683_v31, 0.0 }
 0x1a9   : > { %v1222_v34 = vpop.f32.mrf.mxu1  ;;  %1247 = vmatmul.mubr.msk.f32.gmra.mxu0 %vm532_vm2, %v731_v30 }
 0x1aa   : > { %v732_v35 = vmax.f32 %v678_v33, 0.0  ;;  %v693_v37 = vadd.f32 %v1222_v34, %v1078_v11 }
 0x1ab   : > { %v687_v38 = vpop.f32.mrf.mxu1 }
 0x1ac   : > { %v688_v39 = vadd.f32 %v1078_v11, %v687_v38  ;;  %1249 = vmatprep.mubr.msk.f32.mxu0 %vm532_vm2, %v732_v35  ;;  %v735_v42 = vmax.f32 %v693_v37, 0.0 }
 0x1ad   : > { %v1225_v40 = vpop.f32.mrf.mxu1  ;;  %1250 = vmatmul.mubr.msk.f32.gmra.mxu0 %vm532_vm2, %v733_v36 }
 0x1ae   : > { %v734_v41 = vmax.f32 %v688_v39, 0.0  ;;  %v703_v43 = vadd.f32 %v1225_v40, %v1078_v11 }
 0x1af   : > { %v697_v44 = vpop.f32.mrf.mxu1 }
 0x1b0   : > { %v698_v45 = vadd.f32 %v1078_v11, %v697_v44  ;;  %1252 = vmatprep.mubr.msk.f32.mxu0 %vm532_vm2, %v734_v41  ;;  %v737_v48 = vmax.f32 %v703_v43, 0.0 }
 0x1b1   : > { %v1228_v46 = vpop.f32.mrf.mxu1  ;;  %1253 = vmatmul.mubr.msk.f32.gmra.mxu0 %vm532_vm2, %v735_v42 }
 0x1b2   : > { %v736_v47 = vmax.f32 %v698_v45, 0.0  ;;  %v713_v49 = vadd.f32 %v1228_v46, %v1078_v11 }
 0x1b3   : > { %v707_v50 = vpop.f32.mrf.mxu1 }
 0x1b4   : > { %v708_v51 = vadd.f32 %v1078_v11, %v707_v50  ;;  %1255 = vmatprep.mubr.msk.f32.mxu0 %vm532_vm2, %v736_v47  ;;  %v739_v54 = vmax.f32 %v713_v49, 0.0 }
 0x1b5   : > { %v1231_v52 = vpop.f32.mrf.mxu1  ;;  %1256 = vmatmul.mubr.msk.f32.gmra.mxu0 %vm532_vm2, %v737_v48 }
 0x1b6   : > { %v738_v53 = vmax.f32 %v708_v51, 0.0  ;;  %v723_v55 = vadd.f32 %v1231_v52, %v1078_v11 }
 0x1b7   : > { %v717_v56 = vpop.f32.mrf.mxu1 }
 0x1b8   : > { %v718_v57 = vadd.f32 %v1078_v11, %v717_v56  ;;  %1258 = vmatprep.mubr.msk.f32.mxu0 %vm532_vm2, %v738_v53  ;;  %v741_v59 = vmax.f32 %v723_v55, 0.0 }
 0x1b9   : > { %1259 = vmatmul.mubr.msk.f32.gmra.mxu0 %vm532_vm2, %v739_v54 }
 0x1ba   : > { %v740_v58 = vmax.f32 %v718_v57, 0.0 }
 0x1bc   : > { %1261 = vmatprep.mubr.msk.f32.mxu0 %vm532_vm2, %v740_v58 }
 0x1bd   : > { %1262 = vmatmul.mubr.msk.f32.gmra.mxu0 %vm532_vm2, %v741_v59 }
 0x261   : > { %v1242_v61 = vpop.f32.mrf.mxu0 }
 0x262   : > { %v873_v62 = vadd.f32 %v1242_v61, %v1477_v60 }
 0x263   : > { %v867_v63 = vpop.f32.mrf.mxu0 }
 0x264   : > { %1276 = vtanh.f32 %v873_v62  ;;  %v868_v0 = vadd.f32 %v1477_v60, %v867_v63 }
 0x265   : > { %v1245_v1 = vpop.f32.mrf.mxu0 }
 0x266   : > { %1278 = vtanh.f32 %v868_v0  ;;  %v883_v2 = vadd.f32 %v1245_v1, %v1477_v60 }
 0x267   : > { %v877_v3 = vpop.f32.mrf.mxu0 }
 0x268   : > { %1280 = vtanh.f32 %v883_v2  ;;  %v878_v4 = vadd.f32 %v1477_v60, %v877_v3 }
 0x269   : > { %v1248_v5 = vpop.f32.mrf.mxu0 }
 0x26a   : > { %1282 = vtanh.f32 %v878_v4  ;;  %v893_v6 = vadd.f32 %v1248_v5, %v1477_v60 }
 0x26b   : > { %v887_v7 = vpop.f32.mrf.mxu0 }
 0x26c   : > { %1284 = vtanh.f32 %v893_v6  ;;  %v888_v8 = vadd.f32 %v1477_v60, %v887_v7 }
 0x26d   : > { %v1251_v9 = vpop.f32.mrf.mxu0 }
 0x26e   : > { %1286 = vtanh.f32 %v888_v8  ;;  %v903_v10 = vadd.f32 %v1251_v9, %v1477_v60 }
 0x26f   : > { %v897_v11 = vpop.f32.mrf.mxu0 }
 0x270   : > { %1288 = vtanh.f32 %v903_v10  ;;  %v898_v12 = vadd.f32 %v1477_v60, %v897_v11 }
 0x271   : > { %v1277_v13 = vpop.eup %1276  ;;  %v1254_v14 = vpop.f32.mrf.mxu0 }
 0x272   : > { %v963_v15 = vmul.f32 2.0, %v1277_v13  ;;  %1290 = vtanh.f32 %v898_v12  ;;  %v913_v16 = vadd.f32 %v1254_v14, %v1477_v60 }
 0x273   : > { %v1279_v17 = vpop.eup %1278  ;;  %v907_v18 = vpop.f32.mrf.mxu0 }
 0x274   : > { %980 = vst.msk [vmem:[%s1492_s16 + $0x8] sm:$0xff] %vm978_vm3, %v963_v15  ;;  %v962_v19 = vmul.f32 2.0, %v1279_v17  ;;  %1292 = vtanh.f32 %v913_v16  ;;  %v908_v20 = vadd.f32 %v1477_v60, %v907_v18 }
 0x275   : > { %v1281_v21 = vpop.eup %1280  ;;  %v1257_v22 = vpop.f32.mrf.mxu0 }
 0x276   : > { %979 = vst.msk [vmem:[%s1492_s16] sm:$0xff] %vm978_vm3, %v962_v19  ;;  %v965_v23 = vmul.f32 2.0, %v1281_v21  ;;  %1294 = vtanh.f32 %v908_v20  ;;  %v923_v24 = vadd.f32 %v1257_v22, %v1477_v60 }
 0x277   : > { %v1283_v25 = vpop.eup %1282  ;;  %v917_v26 = vpop.f32.mrf.mxu0 }
 0x278   : > { %982 = vst.msk [vmem:[%s1492_s16 + $0x18] sm:$0xff] %vm978_vm3, %v965_v23  ;;  %v964_v27 = vmul.f32 2.0, %v1283_v25  ;;  %1296 = vtanh.f32 %v923_v24  ;;  %v918_v28 = vadd.f32 %v1477_v60, %v917_v26 }
 0x279   : > { %v1285_v29 = vpop.eup %1284  ;;  %v1260_v30 = vpop.f32.mrf.mxu0 }
 0x27a   : > { %981 = vst.msk [vmem:[%s1492_s16 + $0x10] sm:$0xff] %vm978_vm3, %v964_v27  ;;  %v967_v31 = vmul.f32 2.0, %v1285_v29  ;;  %1298 = vtanh.f32 %v918_v28  ;;  %v933_v32 = vadd.f32 %v1260_v30, %v1477_v60 }
 0x27b   : > { %v1287_v33 = vpop.eup %1286  ;;  %v927_v34 = vpop.f32.mrf.mxu0 }
 0x27c   : > { %984 = vst.msk [vmem:[%s1492_s16 + $0x28] sm:$0xff] %vm978_vm3, %v967_v31  ;;  %v966_v35 = vmul.f32 2.0, %v1287_v33  ;;  %1300 = vtanh.f32 %v933_v32  ;;  %v928_v36 = vadd.f32 %v1477_v60, %v927_v34 }
 0x27d   : > { %v1289_v37 = vpop.eup %1288  ;;  %v1263_v38 = vpop.f32.mrf.mxu0 }
 0x27e   : > { %983 = vst.msk [vmem:[%s1492_s16 + $0x20] sm:$0xff] %vm978_vm3, %v966_v35  ;;  %v969_v39 = vmul.f32 2.0, %v1289_v37  ;;  %1302 = vtanh.f32 %v928_v36  ;;  %v943_v40 = vadd.f32 %v1263_v38, %v1477_v60 }
 0x27f   : > { %v1291_v41 = vpop.eup %1290  ;;  %v937_v42 = vpop.f32.mrf.mxu0 }
 0x280   : > { %986 = vst.msk [vmem:[%s1492_s16 + $0x38] sm:$0xff] %vm978_vm3, %v969_v39  ;;  %v968_v43 = vmul.f32 2.0, %v1291_v41  ;;  %1304 = vtanh.f32 %v943_v40  ;;  %v938_v44 = vadd.f32 %v1477_v60, %v937_v42 }
 0x281   : > { %v1293_v45 = vpop.eup %1292 }
 0x282   : > { %985 = vst.msk [vmem:[%s1492_s16 + $0x30] sm:$0xff] %vm978_vm3, %v968_v43  ;;  %v971_v46 = vmul.f32 2.0, %v1293_v45  ;;  %1306 = vtanh.f32 %v938_v44 }
 0x283   : > { %v1295_v47 = vpop.eup %1294 }
 0x284   : > { %988 = vst.msk [vmem:[%s1492_s16 + $0x48] sm:$0xff] %vm978_vm3, %v971_v46  ;;  %v970_v48 = vmul.f32 2.0, %v1295_v47 }
 0x285   : > { %v1297_v49 = vpop.eup %1296 }
 0x286   : > { %987 = vst.msk [vmem:[%s1492_s16 + $0x40] sm:$0xff] %vm978_vm3, %v970_v48  ;;  %v973_v50 = vmul.f32 2.0, %v1297_v49 }
 0x287   : > { %v1299_v51 = vpop.eup %1298 }
 0x288   : > { %990 = vst.msk [vmem:[%s1492_s16 + $0x58] sm:$0xff] %vm978_vm3, %v973_v50  ;;  %v972_v52 = vmul.f32 2.0, %v1299_v51 }
 0x289   : > { %v1301_v53 = vpop.eup %1300 }
 0x28a   : > { %989 = vst.msk [vmem:[%s1492_s16 + $0x50] sm:$0xff] %vm978_vm3, %v972_v52  ;;  %v975_v54 = vmul.f32 2.0, %v1301_v53 }
 0x28b   : > { %v1303_v55 = vpop.eup %1302 }
 0x28c   : > { %992 = vst.msk [vmem:[%s1492_s16 + $0x68] sm:$0xff] %vm978_vm3, %v975_v54  ;;  %v974_v56 = vmul.f32 2.0, %v1303_v55 }
 0x28d   : > { %v1305_v57 = vpop.eup %1304 }
 0x28e   : > { %991 = vst.msk [vmem:[%s1492_s16 + $0x60] sm:$0xff] %vm978_vm3, %v974_v56  ;;  %v977_v58 = vmul.f32 2.0, %v1305_v57 }
 0x28f   : > { %v1307_v59 = vpop.eup %1306 }
 0x290   : > { %994 = vst.msk [vmem:[%s1492_s16 + $0x78] sm:$0xff] %vm978_vm3, %v977_v58  ;;  %v976_v60 = vmul.f32 2.0, %v1307_v59 }
 0x292   : > { %993 = vst.msk [vmem:[%s1492_s16 + $0x70] sm:$0xff] %vm978_vm3, %v976_v60 }
 0x293 PF: > { %s17_s24 = sadd.s32 1, %s1314_s24  }
 0x294   : > { %p14_p4 = scmp.ge.s32.totalorder %s17_s24, 4  }
 0x296   :  { %16 = sbr.rel (!%p14_p4) target bundleno = 1 (0x1), region = 78 }

</bundles_post_ra>
